<compile_context>
chip_gen: v5e
topology: v5e:2x2
jax: 0.10.0
libtpu: 0.0.40
codegen_flags: <defaults>
</compile_context>

<pallas_src>
import jax
import jax.numpy as jnp
from jax.experimental import pallas as pl
from jax.experimental.pallas import tpu as pltpu

TILE_B = 128  # batch tile: 3*TILE_B = 384 input lanes, 4*TILE_B = 512 output lanes


# ---------------------------------------------------------------------------
# Single-shot kernel: one (3,3) input -> one (3,4) output.
# ---------------------------------------------------------------------------
def net_single_kernel(params_ref, x_ref, o_ref):
    pr = params_ref[...]          # (8,4): rows 0:3 = param1 (cols 0:3), rows 4:8 = [W^T ; b]
    x = x_ref[...]                # (3,3) input (own operand -- no slab rebuild per call)
    p = pr[0:3, 0:3]              # param1 (3,3)
    w = pr[4:8, :]                # W_aug = [W^T ; b]  (4,4)

    # h = param1 @ x : K=3 unrolled VPU FMAs (kept off the MXU for v5e/v6e MRF latency).
    h = (p[:, 0:1] * x[0:1, :]
         + p[:, 1:2] * x[1:2, :]
         + p[:, 2:3] * x[2:3, :])                 # (3, 3)

    # y = [h | 1] @ [W^T ; b]  (bias folded into the augmented weight).
    y = (h[:, 0:1] * w[0:1, :]
         + h[:, 1:2] * w[1:2, :]
         + h[:, 2:3] * w[2:3, :]
         + w[3:4, :])                             # (3, 4)

    o_ref[...] = y


def pack_single_params(param1, w, b):
    """Pack param1 and the augmented Linear weight into one (8,4) slab (built once)."""
    w_aug = jnp.concatenate(
        [w.T.astype(jnp.float32), b.reshape(1, 4).astype(jnp.float32)], axis=0)  # (4,4)
    slab = jnp.zeros((8, 4), jnp.float32)
    slab = slab.at[0:3, 0:3].set(param1.astype(jnp.float32))
    slab = slab.at[4:8, :].set(w_aug)
    return slab


@jax.jit
def net_forward(params_slab, x):
    """Single-shot path: params_slab (8,4) static, x (3,3) -> (3,4)."""
    return pl.pallas_call(
        net_single_kernel,
        out_shape=jax.ShapeDtypeStruct((3, 4), jnp.float32),
        in_specs=[pl.BlockSpec(memory_space=pltpu.VMEM),
                  pl.BlockSpec(memory_space=pltpu.VMEM)],
        out_specs=pl.BlockSpec(memory_space=pltpu.VMEM),
        cost_estimate=pl.CostEstimate(flops=84, transcendentals=0, bytes_accessed=320),
    )(params_slab, x.astype(jnp.float32))


# ---------------------------------------------------------------------------
# Batched kernel: B inputs of shape (3,3) -> B outputs of shape (3,4).
# Lane-dense slab layout, both contractions on the MXU.
# ---------------------------------------------------------------------------
def net_batched_kernel(p_ref, bdw_ref, bias_ref, x_ref, o_ref):
    # x_ref: (8, 3*TB) -- rows 0:3 hold TB inputs, batch interleaved along lanes
    #        (input b occupies lanes 3b:3b+3); rows 3:8 are zero padding.
    h = jnp.dot(p_ref[...], x_ref[...], preferred_element_type=jnp.float32)   # (8, 3*TB)
    y = jnp.dot(h, bdw_ref[...], preferred_element_type=jnp.float32)          # (8, 4*TB)
    o_ref[...] = y + bias_ref[...]                                            # bias tiled per batch


def pack_batched_params(param1, w, b, tile_b=TILE_B):
    """Precompute (once) the batched-kernel parameter operands."""
    p_pad = jnp.zeros((8, 8), jnp.float32).at[0:3, 0:3].set(param1.astype(jnp.float32))
    # blockdiag_TB(W^T): (3*TB, 4*TB); constant index_map keeps it resident across grid steps.
    bdw = jnp.kron(jnp.eye(tile_b, dtype=jnp.float32), w.T.astype(jnp.float32))
    bias_t = jnp.tile(b.astype(jnp.float32), tile_b).reshape(1, 4 * tile_b)
    return p_pad, bdw, bias_t


@jax.jit
def net_forward_batched(p_pad, bdw, bias_t, x):
    """Batched path: x (B, 3, 3) -> (B, 3, 4); B must be a multiple of TILE_B."""
    B = x.shape[0]
    tb = bdw.shape[1] // 4
    nt = B // tb
    assert nt * tb == B, "batch must be a multiple of the batch tile"

    # Lane-dense input slab: X[i, 3b + j] = x[b, i, j]; rows 3:8 are zero padding.
    # (Layout plumbing proportional to the input, not a parameter-slab copy.)
    xw = jnp.zeros((8, 3 * B), jnp.float32).at[0:3, :].set(
        x.astype(jnp.float32).transpose(1, 0, 2).reshape(3, 3 * B))

    flops = nt * (2 * 8 * 8 * (3 * tb) + 2 * 8 * (3 * tb) * (4 * tb))
    bytes_accessed = 4 * (p_pad.size + bdw.size + bias_t.size + xw.size + 8 * 4 * B)

    yw = pl.pallas_call(
        net_batched_kernel,
        out_shape=jax.ShapeDtypeStruct((8, 4 * B), jnp.float32),
        grid_spec=pltpu.PrefetchScalarGridSpec(
            num_scalar_prefetch=0,
            grid=(nt,),
            in_specs=[
                pl.BlockSpec((8, 8), lambda i: (0, 0)),             # padded param1
                pl.BlockSpec((3 * tb, 4 * tb), lambda i: (0, 0)),   # blockdiag(W^T), resident
                pl.BlockSpec((1, 4 * tb), lambda i: (0, 0)),        # tiled bias, resident
                pl.BlockSpec((8, 3 * tb), lambda i: (0, i)),        # input slab tile
            ],
            out_specs=pl.BlockSpec((8, 4 * tb), lambda i: (0, i)),  # lane-dense output tile
        ),
        compiler_params=pltpu.CompilerParams(
            dimension_semantics=("parallel",)),                     # v7x: both TCs
        cost_estimate=pl.CostEstimate(
            flops=flops, transcendentals=0, bytes_accessed=bytes_accessed),
    )(p_pad, bdw, bias_t, xw)

    # Undo the lane-dense layout: Y[i, 4b + o] -> (B, 3, 4).
    return yw[0:3, :].reshape(3, B, 4).transpose(1, 0, 2)


def net_reference(param1, w, b, x):
    """Fused pure-XLA forward (recommended path for the true single-call case)."""
    return (param1 @ x) @ w.T + b


if __name__ == "__main__":
    key = jax.random.PRNGKey(0)
    k_p, k_w, k_b, k_x, k_xb = jax.random.split(key, 5)

    # Deterministic "parameters" (shapes from the PyTorch __init__).
    param1 = jax.random.uniform(k_p, (3, 3), dtype=jnp.float32)           # nn.Parameter(t.rand(3,3))
    w = jax.random.uniform(k_w, (4, 3), dtype=jnp.float32) * 0.5 - 0.25   # Linear(3,4).weight
    b = jax.random.uniform(k_b, (4,), dtype=jnp.float32) * 0.5 - 0.25     # Linear(3,4).bias

    # ---- single-shot path --------------------------------------------------
    x = jax.random.normal(k_x, (3, 3), dtype=jnp.float32)
    params_slab = jax.block_until_ready(pack_single_params(param1, w, b))
    out_single = jax.block_until_ready(net_forward(params_slab, x))
    ref_single = net_reference(param1, w, b, x)
    assert out_single.shape == (3, 4)
    assert jnp.allclose(out_single, ref_single, atol=1e-5, rtol=1e-5)

    # ---- batched path (amortizes launch overhead; lane-dense; MXU) ---------
    B = 2 * TILE_B
    xb = jax.random.normal(k_xb, (B, 3, 3), dtype=jnp.float32)
    p_pad, bdw, bias_t = jax.block_until_ready(pack_batched_params(param1, w, b))
    out_batched = jax.block_until_ready(net_forward_batched(p_pad, bdw, bias_t, xb))
    ref_batched = net_reference(param1, w, b, xb)
    assert out_batched.shape == (B, 3, 4)
    assert jnp.allclose(out_batched, ref_batched, atol=1e-4, rtol=1e-4)

    print("KERNEL_OK")
</pallas_src>

<mosaic_0001>
module attributes {stable_mosaic.version = 11 : i64} {
  func.func @net_single_kernel(%arg0: memref<8x4xf32, #tpu.memory_space<vmem>>, %arg1: memref<3x3xf32, #tpu.memory_space<vmem>>, %arg2: memref<3x4xf32, #tpu.memory_space<vmem>>) attributes {dimension_semantics = [], scalar_prefetch = 0 : i64, scratch_operands = 0 : i64, tpu.core_type = #tpu.core_type<tc>} {
    %c0 = arith.constant 0 : index
    %c0_0 = arith.constant 0 : index
    %0 = vector.load %arg0[%c0, %c0_0] : memref<8x4xf32, #tpu.memory_space<vmem>>, vector<8x4xf32>
    %c0_1 = arith.constant 0 : index
    %c0_2 = arith.constant 0 : index
    %1 = vector.load %arg1[%c0_1, %c0_2] : memref<3x3xf32, #tpu.memory_space<vmem>>, vector<3x3xf32>
    %2 = vector.extract_strided_slice %0 {offsets = [0, 0], sizes = [3, 3], strides = [1, 1]} : vector<8x4xf32> to vector<3x3xf32>
    %3 = vector.extract_strided_slice %0 {offsets = [4, 0], sizes = [4, 4], strides = [1, 1]} : vector<8x4xf32> to vector<4x4xf32>
    %4 = vector.extract_strided_slice %2 {offsets = [0, 0], sizes = [3, 1], strides = [1, 1]} : vector<3x3xf32> to vector<3x1xf32>
    %5 = vector.extract_strided_slice %1 {offsets = [0, 0], sizes = [1, 3], strides = [1, 1]} : vector<3x3xf32> to vector<1x3xf32>
    %6 = vector.broadcast %4 : vector<3x1xf32> to vector<3x3xf32>
    %7 = vector.broadcast %5 : vector<1x3xf32> to vector<3x3xf32>
    %8 = arith.mulf %6, %7 : vector<3x3xf32>
    %9 = vector.extract_strided_slice %2 {offsets = [0, 1], sizes = [3, 1], strides = [1, 1]} : vector<3x3xf32> to vector<3x1xf32>
    %10 = vector.extract_strided_slice %1 {offsets = [1, 0], sizes = [1, 3], strides = [1, 1]} : vector<3x3xf32> to vector<1x3xf32>
    %11 = vector.broadcast %9 : vector<3x1xf32> to vector<3x3xf32>
    %12 = vector.broadcast %10 : vector<1x3xf32> to vector<3x3xf32>
    %13 = arith.mulf %11, %12 : vector<3x3xf32>
    %14 = arith.addf %8, %13 : vector<3x3xf32>
    %15 = vector.extract_strided_slice %2 {offsets = [0, 2], sizes = [3, 1], strides = [1, 1]} : vector<3x3xf32> to vector<3x1xf32>
    %16 = vector.extract_strided_slice %1 {offsets = [2, 0], sizes = [1, 3], strides = [1, 1]} : vector<3x3xf32> to vector<1x3xf32>
    %17 = vector.broadcast %15 : vector<3x1xf32> to vector<3x3xf32>
    %18 = vector.broadcast %16 : vector<1x3xf32> to vector<3x3xf32>
    %19 = arith.mulf %17, %18 : vector<3x3xf32>
    %20 = arith.addf %14, %19 : vector<3x3xf32>
    %21 = vector.extract_strided_slice %20 {offsets = [0, 0], sizes = [3, 1], strides = [1, 1]} : vector<3x3xf32> to vector<3x1xf32>
    %22 = vector.extract_strided_slice %3 {offsets = [0, 0], sizes = [1, 4], strides = [1, 1]} : vector<4x4xf32> to vector<1x4xf32>
    %23 = vector.broadcast %21 : vector<3x1xf32> to vector<3x4xf32>
    %24 = vector.broadcast %22 : vector<1x4xf32> to vector<3x4xf32>
    %25 = arith.mulf %23, %24 : vector<3x4xf32>
    %26 = vector.extract_strided_slice %20 {offsets = [0, 1], sizes = [3, 1], strides = [1, 1]} : vector<3x3xf32> to vector<3x1xf32>
    %27 = vector.extract_strided_slice %3 {offsets = [1, 0], sizes = [1, 4], strides = [1, 1]} : vector<4x4xf32> to vector<1x4xf32>
    %28 = vector.broadcast %26 : vector<3x1xf32> to vector<3x4xf32>
    %29 = vector.broadcast %27 : vector<1x4xf32> to vector<3x4xf32>
    %30 = arith.mulf %28, %29 : vector<3x4xf32>
    %31 = arith.addf %25, %30 : vector<3x4xf32>
    %32 = vector.extract_strided_slice %20 {offsets = [0, 2], sizes = [3, 1], strides = [1, 1]} : vector<3x3xf32> to vector<3x1xf32>
    %33 = vector.extract_strided_slice %3 {offsets = [2, 0], sizes = [1, 4], strides = [1, 1]} : vector<4x4xf32> to vector<1x4xf32>
    %34 = vector.broadcast %32 : vector<3x1xf32> to vector<3x4xf32>
    %35 = vector.broadcast %33 : vector<1x4xf32> to vector<3x4xf32>
    %36 = arith.mulf %34, %35 : vector<3x4xf32>
    %37 = arith.addf %31, %36 : vector<3x4xf32>
    %38 = vector.extract_strided_slice %3 {offsets = [3, 0], sizes = [1, 4], strides = [1, 1]} : vector<4x4xf32> to vector<1x4xf32>
    %39 = vector.broadcast %38 : vector<1x4xf32> to vector<3x4xf32>
    %40 = arith.addf %37, %39 : vector<3x4xf32>
    %c0_3 = arith.constant 0 : index
    %c0_4 = arith.constant 0 : index
    %41 = vector.load %arg2[%c0_3, %c0_4] : memref<3x4xf32, #tpu.memory_space<vmem>>, vector<3x4xf32>
    tpu.vector_store %arg2[%c0_3, %c0_4], %40 {strides = array<i32>} : memref<3x4xf32, #tpu.memory_space<vmem>>, vector<3x4xf32>,
    return
  }
}

</mosaic_0001>

<bundles_post_ra>
// kernel: net_forward.1
= control target key start
LH: loop header
LB: loop body
LE: loop exit
PB: predicated region body
PF: predicated region fallthrough
CT: control target
= control target key end

     0   :  { %v113_v1 = vmov 0   ;;  %v114_v2 = vmov 2   ;;  %s141_s0 = inlined_call_operand.vmem [shape: f32[8,4], index: 0, kind: input, shape index: {}]   ;;  %s142_s1 = inlined_call_operand.vmem [shape: f32[3,3], index: 1, kind: input, shape index: {}]   ;;  %s143_s2 = inlined_call_operand.hbm [shape: f32[3,4], index: 2, kind: output, shape index: {}]  }
   0x1   :  { %v12_v0 = vld [vmem:[%s141_s0] sm:$0xff]  ;;  %80 = vset.pattern.permute.xlu0 %v113_v1  ;;  %82 = vset.pattern.permute.xlu1 %v114_v2 }
   0x2   :  { %7 = vsyncpa [#allocation3], 0  ;;  %16 = vperm.xlu0 %80, %v12_v0   ;;  %29 = vperm.xlu1 %82, %v12_v0   ;;  %v115_v3 = vmov 1   ;;  %v13_v5 = vld [vmem:[%s142_s1] sm:$0x7]  ;;  %v46_v17 = vperm.slane %v12_v0, 5 }
   0x3   :  { %84 = vset.pattern.permute.xlu2 %v115_v3  ;;  %v19_v6 = vperm.slane %v13_v5, 0  ;;  %v25_v7 = vperm.slane %v13_v5, 1  ;;  %v32_v8 = vperm.slane %v13_v5, 2  ;;  %v40_v18 = vperm.slane %v12_v0, 4  ;;  %s116_s0 = smov [#allocation2]   ;;  %s67_s15 = sshll.u32 %s143_s2, 4  ;;  %s68_s15 = int_to_ptr.hbm [resolvable:$true] %s67_s15 }
   0x4   :  { %v53_v19 = vperm.slane %v12_v0, 6  ;;  %v56_v26 = vperm.slane %v12_v0, 7  ;;  %s65_s1 = sshll.u32 %s116_s0, 4  ;;  %vm58_vm0 = vcmask 26624   ;;  %s66_s1 = int_to_ptr.vmem [resolvable:$true] %s65_s1 }
   0xa   :  { %81 = vset.pattern.permute.xlu0 %v115_v3  ;;  %83 = vset.pattern.permute.xlu1 %v113_v1 }
   0xb   :  { %22 = vperm.xlu0 %81, %v12_v0  }
  0x13   :  { %86 = vset.pattern.permute.xlu0 %v114_v2 }
  0x74   :  { %v17_v4 = vpop.permute.xlu0 %16  ;;  %v30_v9 = vpop.permute.xlu1 %29 }
  0x75   :  { %v20_v11 = vmul.f32 %v19_v6, %v17_v4  ;;  %v33_v13 = vmul.f32 %v32_v8, %v30_v9 }
  0x7d   :  { %v23_v10 = vpop.permute.xlu0 %22 }
  0x7e   :  { %v26_v12 = vmul.f32 %v25_v7, %v23_v10 }
  0x80   :  { %v27_v14 = vadd.f32 %v26_v12, %v20_v11 }
  0x82   :  { %v34_v15 = vadd.f32 %v33_v13, %v27_v14 }
  0x84   :  { %43 = vperm.xlu2 %84, %v34_v15   ;;  %37 = vperm.xlu1 %83, %v34_v15  }
  0x8c   :  { %85 = vset.pattern.permute.xlu2 %v114_v2 }
  0x8d   :  { %50 = vperm.xlu2 %85, %v34_v15  }
  0xde   :  { %v44_v16 = vpop.permute.xlu2 %43 }
  0xdf   :  { %v47_v22 = vmul.f32 %v46_v17, %v44_v16 }
  0xe7   :  { %v51_v20 = vpop.permute.xlu2 %50 }
  0xe8   :  { %v54_v24 = vmul.f32 %v53_v19, %v51_v20 }
  0xf6   :  { %v38_v21 = vpop.permute.xlu1 %37 }
  0xf7   :  { %v41_v23 = vmul.f32 %v40_v18, %v38_v21 }
  0xf9   :  { %v48_v25 = vadd.f32 %v47_v22, %v41_v23 }
  0xfb   :  { %v55_v27 = vadd.f32 %v54_v24, %v48_v25 }
  0xfd   :  { %v57_v28 = vadd.f32 %v56_v26, %v55_v27 }
  0xff   :  { %59 = vst.msk [vmem:[#allocation2] sm:$0x7] %vm58_vm0, %v57_v28 }
 0x100   :  { %70 = dma.vmem_to_hbm [thread:$0]  %s66_s1, 64, %s68_s15, [#allocation3]  }
 0x101   :  { %111 = dma.done.wait [#allocation3], 64  }
 0x102   :  { %112 = vsyncadd [#allocation3], 4294967232 }
 0x103   :  { %75 = vsyncpa [#allocation3], 1 }

</bundles_post_ra>
